<compile_context>
chip_gen: v5e
topology: v5e:2x2
jax: 0.10.0
libtpu: 0.0.40
codegen_flags: <defaults>
</compile_context>

<pallas_src>
import functools

import jax
import jax.numpy as jnp
from jax.experimental import pallas as pl
from jax.experimental.pallas import tpu as pltpu


LANES = 128
MAX_ROWS_PER_TILE = 4096          # (4096, 128) f32 block = 2 MiB per operand
VMEM_LIMIT_BYTES = 32 * 1024 * 1024


def _round_up(a: int, b: int) -> int:
    return ((a + b - 1) // b) * b


def _num_tensorcores() -> int:
    """Best-effort TensorCore count per chip; defaults to 1 (v5e/v6e)."""
    try:
        info = pltpu.get_tpu_info()
    except Exception:
        return 1
    for attr in ("num_cores", "core_count", "tensor_core_count",
                 "num_tensorcores", "cores_per_chip"):
        v = getattr(info, attr, None)
        if isinstance(v, int) and 1 <= v <= 8:
            return v
    return 1


def _l1_roi_kernel(x_ref, t_ref, m_ref,        # inputs  (rows_per_tile, LANES)
                   out_l1_ref, out_roi_ref,    # outputs (1, 1, LANES) per shard
                   *, valid_rows, rows_per_tile, steps_per_shard):
    s = pl.program_id(0)   # shard (parallel; one per TensorCore on v7x)
    i = pl.program_id(1)   # step within shard (arbitrary / sequential)

    # Outputs are grid-resident across the step axis: zero them once.
    @pl.when(i == 0)
    def _():
        out_l1_ref[...] = jnp.zeros_like(out_l1_ref)
        out_roi_ref[...] = jnp.zeros_like(out_roi_ref)

    # Load once; upcast in-register (narrow dtypes stay narrow in HBM/VMEM).
    x = x_ref[...].astype(jnp.float32)
    t = t_ref[...].astype(jnp.float32)
    m = m_ref[...].astype(jnp.float32)

    # Raw (unclamped) block index.  Tiles fully inside the valid row range take
    # the fast path; only the ragged last tile / clamped duplicates pay for the
    # iota/compare/select masking.
    raw_block = s * steps_per_shard + i
    in_bounds = (raw_block + 1) * rows_per_tile <= valid_rows

    @pl.when(in_bounds)
    def _():
        out_l1_ref[...] += jnp.sum(jnp.abs(x - t), axis=0, keepdims=True)[None]
        out_roi_ref[...] += jnp.sum(m, axis=0, keepdims=True)[None]

    @pl.when(jnp.logical_not(in_bounds))
    def _():
        row_ids = (jax.lax.broadcasted_iota(jnp.int32, x.shape, 0)
                   + raw_block * rows_per_tile)
        valid = row_ids < valid_rows
        # NOTE: keep this a select (jnp.where), not a multiply -- rows past the
        # logical end may hold uninitialized data.
        diff = jnp.where(valid, jnp.abs(x - t), 0.0)
        msk = jnp.where(valid, m, 0.0)
        out_l1_ref[...] += jnp.sum(diff, axis=0, keepdims=True)[None]
        out_roi_ref[...] += jnp.sum(msk, axis=0, keepdims=True)[None]


def l1_roi(inputs: jax.Array, masks: jax.Array, targets: jax.Array):
    """Pallas implementation of L1_ROI.forward -> (mae / roi, roi)."""
    n = inputs.size
    x = inputs.reshape(-1)
    t = targets.reshape(-1)
    m = masks.reshape(-1)

    # Common case (image tensors): n % 128 == 0 -> reshape is copy-free.
    n_pad = _round_up(n, LANES)
    if n_pad != n:
        # TODO(synk): rare fallback; zero padding does not change either sum.
        x = jnp.pad(x, (0, n_pad - n))
        t = jnp.pad(t, (0, n_pad - n))
        m = jnp.pad(m, (0, n_pad - n))

    rows = n_pad // LANES
    x2 = x.reshape(rows, LANES)
    t2 = t.reshape(rows, LANES)
    m2 = m.reshape(rows, LANES)

    # Tile sizing: big streaming blocks; for small inputs a single block equal
    # to the full array dims (valid for any dtype's sublane tiling).
    if rows >= MAX_ROWS_PER_TILE:
        rows_per_tile = MAX_ROWS_PER_TILE
    else:
        rows_per_tile = rows
    n_blocks = pl.cdiv(rows, rows_per_tile)

    # One shard per TensorCore (v7x megacore); never more shards than blocks.
    num_shards = max(1, min(_num_tensorcores(), n_blocks))
    steps_per_shard = pl.cdiv(n_blocks, num_shards)

    kernel = functools.partial(
        _l1_roi_kernel,
        valid_rows=rows,
        rows_per_tile=rows_per_tile,
        steps_per_shard=steps_per_shard,
    )

    # Clamp out-of-range block indices directly in the index_map; the in-kernel
    # masked path zeroes the duplicated tiles' contributions.
    in_map = lambda s, i: (jnp.minimum(s * steps_per_shard + i, n_blocks - 1), 0)
    out_map = lambda s, i: (s, 0, 0)

    out_l1, out_roi = pl.pallas_call(
        kernel,
        out_shape=(
            jax.ShapeDtypeStruct((num_shards, 1, LANES), jnp.float32),
            jax.ShapeDtypeStruct((num_shards, 1, LANES), jnp.float32),
        ),
        grid_spec=pltpu.PrefetchScalarGridSpec(
            num_scalar_prefetch=0,
            grid=(num_shards, steps_per_shard),
            in_specs=[
                pl.BlockSpec((rows_per_tile, LANES), in_map),
                pl.BlockSpec((rows_per_tile, LANES), in_map),
                pl.BlockSpec((rows_per_tile, LANES), in_map),
            ],
            out_specs=[
                pl.BlockSpec((1, 1, LANES), out_map),
                pl.BlockSpec((1, 1, LANES), out_map),
            ],
        ),
        compiler_params=pltpu.CompilerParams(
            dimension_semantics=("parallel", "arbitrary"),
            vmem_limit_bytes=VMEM_LIMIT_BYTES,
        ),
    )(x2, t2, m2)

    # Final (tiny) cross-lane / cross-shard reductions and the division.
    mae = jnp.sum(out_l1)
    roi = jnp.sum(out_roi)
    # NOTE: roi == 0 yields inf/nan, matching the PyTorch reference.
    return mae / roi, roi


def _l1_roi_ref(inputs, masks, targets):
    mae = jnp.sum(jnp.abs(inputs.astype(jnp.float32) - targets.astype(jnp.float32)))
    roi = jnp.sum(masks.astype(jnp.float32))
    return mae / roi, roi


if __name__ == "__main__":
    key = jax.random.PRNGKey(0)
    k1, k2, k3 = jax.random.split(key, 3)

    # NCHW shapes consistent with a segmentation/regression-style loss input.
    B, C, H, W = 2, 4, 16, 16
    inputs = jax.random.normal(k1, (B, C, H, W), dtype=jnp.float32)
    targets = jax.random.normal(k2, (B, C, H, W), dtype=jnp.float32)
    masks = (jax.random.uniform(k3, (B, C, H, W)) > 0.5).astype(jnp.float32)

    loss, roi = l1_roi(inputs, masks, targets)
    jax.block_until_ready(loss)
    jax.block_until_ready(roi)

    ref_loss, ref_roi = _l1_roi_ref(inputs, masks, targets)
    assert jnp.allclose(loss, ref_loss, rtol=1e-5, atol=1e-6), (loss, ref_loss)
    assert jnp.allclose(roi, ref_roi, rtol=1e-6, atol=1e-6), (roi, ref_roi)

    # Narrow-dtype path (bandwidth win): bf16 inputs/targets, uint8 masks.
    k4, k5, k6 = jax.random.split(jax.random.PRNGKey(1), 3)
    B2, C2, H2, W2 = 2, 4, 32, 32
    x_bf = jax.random.normal(k4, (B2, C2, H2, W2), dtype=jnp.bfloat16)
    t_bf = jax.random.normal(k5, (B2, C2, H2, W2), dtype=jnp.bfloat16)
    m_u8 = (jax.random.uniform(k6, (B2, C2, H2, W2)) > 0.5).astype(jnp.uint8)

    loss2, roi2 = l1_roi(x_bf, m_u8, t_bf)
    jax.block_until_ready(loss2)
    jax.block_until_ready(roi2)

    ref_loss2, ref_roi2 = _l1_roi_ref(x_bf, m_u8, t_bf)
    assert jnp.allclose(loss2, ref_loss2, rtol=1e-3, atol=1e-3), (loss2, ref_loss2)
    assert jnp.allclose(roi2, ref_roi2, rtol=1e-6, atol=1e-6), (roi2, ref_roi2)

    print("KERNEL_OK")
</pallas_src>

<mosaic_0001>
module attributes {stable_mosaic.version = 11 : i64} {
  func.func @_l1_roi_kernel(%arg0: i32, %arg1: i32, %arg2: memref<16x128xf32, #tpu.memory_space<vmem>>, %arg3: memref<16x128xf32, #tpu.memory_space<vmem>>, %arg4: memref<16x128xf32, #tpu.memory_space<vmem>>, %arg5: memref<1x1x128xf32, #tpu.memory_space<vmem>>, %arg6: memref<1x1x128xf32, #tpu.memory_space<vmem>>) attributes {dimension_semantics = [#tpu.dimension_semantics<parallel>, #tpu.dimension_semantics<arbitrary>], iteration_bounds = array<i64: 1, 1>, scalar_prefetch = 0 : i64, scratch_operands = 0 : i64, tpu.core_type = #tpu.core_type<tc>, window_params = [{transform_indices = @transform_0, window_bounds = array<i64: 16, 128>}, {transform_indices = @transform_1, window_bounds = array<i64: 16, 128>}, {transform_indices = @transform_2, window_bounds = array<i64: 16, 128>}, {transform_indices = @transform_3, window_bounds = array<i64: 1, 1, 128>}, {transform_indices = @transform_4, window_bounds = array<i64: 1, 1, 128>}]} {
    %c0_i32 = arith.constant 0 : i32
    %0 = arith.cmpi eq, %arg1, %c0_i32 : i32
    %1 = arith.extui %0 : i1 to i32
    %c0_i32_0 = arith.constant 0 : i32
    %2 = arith.cmpi ne, %1, %c0_i32_0 : i32
    scf.if %2 {
      %cst = arith.constant 0.000000e+00 : f32
      %16 = vector.broadcast %cst : f32 to vector<1x1x128xf32>
      %c0_10 = arith.constant 0 : index
      %c0_11 = arith.constant 0 : index
      %c0_12 = arith.constant 0 : index
      %17 = vector.load %arg5[%c0_10, %c0_11, %c0_12] : memref<1x1x128xf32, #tpu.memory_space<vmem>>, vector<1x1x128xf32>
      tpu.vector_store %arg5[%c0_10, %c0_11, %c0_12], %16 {strides = array<i32>} : memref<1x1x128xf32, #tpu.memory_space<vmem>>, vector<1x1x128xf32>,
      %cst_13 = arith.constant 0.000000e+00 : f32
      %18 = vector.broadcast %cst_13 : f32 to vector<1x1x128xf32>
      %c0_14 = arith.constant 0 : index
      %c0_15 = arith.constant 0 : index
      %c0_16 = arith.constant 0 : index
      %19 = vector.load %arg6[%c0_14, %c0_15, %c0_16] : memref<1x1x128xf32, #tpu.memory_space<vmem>>, vector<1x1x128xf32>
      tpu.vector_store %arg6[%c0_14, %c0_15, %c0_16], %18 {strides = array<i32>} : memref<1x1x128xf32, #tpu.memory_space<vmem>>, vector<1x1x128xf32>,
    } else {
    }
    %c0 = arith.constant 0 : index
    %c0_1 = arith.constant 0 : index
    %3 = vector.load %arg2[%c0, %c0_1] : memref<16x128xf32, #tpu.memory_space<vmem>>, vector<16x128xf32>
    %c0_2 = arith.constant 0 : index
    %c0_3 = arith.constant 0 : index
    %4 = vector.load %arg3[%c0_2, %c0_3] : memref<16x128xf32, #tpu.memory_space<vmem>>, vector<16x128xf32>
    %c0_4 = arith.constant 0 : index
    %c0_5 = arith.constant 0 : index
    %5 = vector.load %arg4[%c0_4, %c0_5] : memref<16x128xf32, #tpu.memory_space<vmem>>, vector<16x128xf32>
    %c1_i32 = arith.constant 1 : i32
    %6 = arith.muli %arg0, %c1_i32 : i32
    %7 = arith.addi %6, %arg1 : i32
    %c1_i32_6 = arith.constant 1 : i32
    %8 = arith.addi %7, %c1_i32_6 : i32
    %c16_i32 = arith.constant 16 : i32
    %9 = arith.muli %8, %c16_i32 : i32
    %c16_i32_7 = arith.constant 16 : i32
    %10 = arith.cmpi sle, %9, %c16_i32_7 : i32
    %11 = arith.extui %10 : i1 to i32
    %c0_i32_8 = arith.constant 0 : i32
    %12 = arith.cmpi ne, %11, %c0_i32_8 : i32
    scf.if %12 {
      %c0_10 = arith.constant 0 : index
      %c0_11 = arith.constant 0 : index
      %c0_12 = arith.constant 0 : index
      %16 = vector.load %arg5[%c0_10, %c0_11, %c0_12] : memref<1x1x128xf32, #tpu.memory_space<vmem>>, vector<1x1x128xf32>
      %17 = arith.subf %3, %4 : vector<16x128xf32>
      %18 = math.absf %17 : vector<16x128xf32>
      %cst = arith.constant dense<0.000000e+00> : vector<128xf32>
      %19 = vector.multi_reduction <add>, %18, %cst [0] : vector<16x128xf32> to vector<128xf32>
      %20 = vector.shape_cast %19 : vector<128xf32> to vector<1x128xf32>
      %21 = vector.shape_cast %20 : vector<1x128xf32> to vector<1x1x128xf32>
      %22 = arith.addf %16, %21 : vector<1x1x128xf32>
      %c0_13 = arith.constant 0 : index
      %c0_14 = arith.constant 0 : index
      %c0_15 = arith.constant 0 : index
      %23 = vector.load %arg5[%c0_13, %c0_14, %c0_15] : memref<1x1x128xf32, #tpu.memory_space<vmem>>, vector<1x1x128xf32>
      tpu.vector_store %arg5[%c0_13, %c0_14, %c0_15], %22 {strides = array<i32>} : memref<1x1x128xf32, #tpu.memory_space<vmem>>, vector<1x1x128xf32>,
      %c0_16 = arith.constant 0 : index
      %c0_17 = arith.constant 0 : index
      %c0_18 = arith.constant 0 : index
      %24 = vector.load %arg6[%c0_16, %c0_17, %c0_18] : memref<1x1x128xf32, #tpu.memory_space<vmem>>, vector<1x1x128xf32>
      %cst_19 = arith.constant dense<0.000000e+00> : vector<128xf32>
      %25 = vector.multi_reduction <add>, %5, %cst_19 [0] : vector<16x128xf32> to vector<128xf32>
      %26 = vector.shape_cast %25 : vector<128xf32> to vector<1x128xf32>
      %27 = vector.shape_cast %26 : vector<1x128xf32> to vector<1x1x128xf32>
      %28 = arith.addf %24, %27 : vector<1x1x128xf32>
      %c0_20 = arith.constant 0 : index
      %c0_21 = arith.constant 0 : index
      %c0_22 = arith.constant 0 : index
      %29 = vector.load %arg6[%c0_20, %c0_21, %c0_22] : memref<1x1x128xf32, #tpu.memory_space<vmem>>, vector<1x1x128xf32>
      tpu.vector_store %arg6[%c0_20, %c0_21, %c0_22], %28 {strides = array<i32>} : memref<1x1x128xf32, #tpu.memory_space<vmem>>, vector<1x1x128xf32>,
    } else {
    }
    %true = arith.constant true
    %13 = arith.xori %10, %true : i1
    %14 = arith.extui %13 : i1 to i32
    %c0_i32_9 = arith.constant 0 : i32
    %15 = arith.cmpi ne, %14, %c0_i32_9 : i32
    scf.if %15 {
      %16 = tpu.iota {dimensions = array<i32: 0>} : vector<16x128xi32>
      %c16_i32_10 = arith.constant 16 : i32
      %17 = arith.muli %7, %c16_i32_10 : i32
      %18 = vector.broadcast %17 : i32 to vector<16x128xi32>
      %19 = arith.addi %16, %18 : vector<16x128xi32>
      %c16_i32_11 = arith.constant 16 : i32
      %20 = vector.broadcast %c16_i32_11 : i32 to vector<16x128xi32>
      %21 = arith.cmpi slt, %19, %20 : vector<16x128xi32>
      %22 = arith.subf %3, %4 : vector<16x128xf32>
      %23 = math.absf %22 : vector<16x128xf32>
      %cst = arith.constant 0.000000e+00 : f32
      %24 = vector.broadcast %cst : f32 to vector<16x128xf32>
      %25 = arith.select %21, %23, %24 : vector<16x128xi1>, vector<16x128xf32>
      %cst_12 = arith.constant 0.000000e+00 : f32
      %26 = vector.broadcast %cst_12 : f32 to vector<16x128xf32>
      %27 = arith.select %21, %5, %26 : vector<16x128xi1>, vector<16x128xf32>
      %c0_13 = arith.constant 0 : index
      %c0_14 = arith.constant 0 : index
      %c0_15 = arith.constant 0 : index
      %28 = vector.load %arg5[%c0_13, %c0_14, %c0_15] : memref<1x1x128xf32, #tpu.memory_space<vmem>>, vector<1x1x128xf32>
      %cst_16 = arith.constant dense<0.000000e+00> : vector<128xf32>
      %29 = vector.multi_reduction <add>, %25, %cst_16 [0] : vector<16x128xf32> to vector<128xf32>
      %30 = vector.shape_cast %29 : vector<128xf32> to vector<1x128xf32>
      %31 = vector.shape_cast %30 : vector<1x128xf32> to vector<1x1x128xf32>
      %32 = arith.addf %28, %31 : vector<1x1x128xf32>
      %c0_17 = arith.constant 0 : index
      %c0_18 = arith.constant 0 : index
      %c0_19 = arith.constant 0 : index
      %33 = vector.load %arg5[%c0_17, %c0_18, %c0_19] : memref<1x1x128xf32, #tpu.memory_space<vmem>>, vector<1x1x128xf32>
      tpu.vector_store %arg5[%c0_17, %c0_18, %c0_19], %32 {strides = array<i32>} : memref<1x1x128xf32, #tpu.memory_space<vmem>>, vector<1x1x128xf32>,
      %c0_20 = arith.constant 0 : index
      %c0_21 = arith.constant 0 : index
      %c0_22 = arith.constant 0 : index
      %34 = vector.load %arg6[%c0_20, %c0_21, %c0_22] : memref<1x1x128xf32, #tpu.memory_space<vmem>>, vector<1x1x128xf32>
      %cst_23 = arith.constant dense<0.000000e+00> : vector<128xf32>
      %35 = vector.multi_reduction <add>, %27, %cst_23 [0] : vector<16x128xf32> to vector<128xf32>
      %36 = vector.shape_cast %35 : vector<128xf32> to vector<1x128xf32>
      %37 = vector.shape_cast %36 : vector<1x128xf32> to vector<1x1x128xf32>
      %38 = arith.addf %34, %37 : vector<1x1x128xf32>
      %c0_24 = arith.constant 0 : index
      %c0_25 = arith.constant 0 : index
      %c0_26 = arith.constant 0 : index
      %39 = vector.load %arg6[%c0_24, %c0_25, %c0_26] : memref<1x1x128xf32, #tpu.memory_space<vmem>>, vector<1x1x128xf32>
      tpu.vector_store %arg6[%c0_24, %c0_25, %c0_26], %38 {strides = array<i32>} : memref<1x1x128xf32, #tpu.memory_space<vmem>>, vector<1x1x128xf32>,
    } else {
    }
    return
  }
  func.func @transform_0(%arg0: i32, %arg1: i32) -> (i32, i32) {
    %c1_i32 = arith.constant 1 : i32
    %0 = arith.muli %arg0, %c1_i32 : i32
    %1 = arith.addi %0, %arg1 : i32
    %c0_i32 = arith.constant 0 : i32
    %2 = arith.minsi %1, %c0_i32 : i32
    %c0_i32_0 = arith.constant 0 : i32
    %c0_i32_1 = arith.constant 0 : i32
    return %2, %c0_i32_0 : i32, i32
  }
  func.func @transform_1(%arg0: i32, %arg1: i32) -> (i32, i32) {
    %c1_i32 = arith.constant 1 : i32
    %0 = arith.muli %arg0, %c1_i32 : i32
    %1 = arith.addi %0, %arg1 : i32
    %c0_i32 = arith.constant 0 : i32
    %2 = arith.minsi %1, %c0_i32 : i32
    %c0_i32_0 = arith.constant 0 : i32
    %c0_i32_1 = arith.constant 0 : i32
    return %2, %c0_i32_0 : i32, i32
  }
  func.func @transform_2(%arg0: i32, %arg1: i32) -> (i32, i32) {
    %c1_i32 = arith.constant 1 : i32
    %0 = arith.muli %arg0, %c1_i32 : i32
    %1 = arith.addi %0, %arg1 : i32
    %c0_i32 = arith.constant 0 : i32
    %2 = arith.minsi %1, %c0_i32 : i32
    %c0_i32_0 = arith.constant 0 : i32
    %c0_i32_1 = arith.constant 0 : i32
    return %2, %c0_i32_0 : i32, i32
  }
  func.func @transform_3(%arg0: i32, %arg1: i32) -> (i32, i32, i32) {
    %c0_i32 = arith.constant 0 : i32
    %c0_i32_0 = arith.constant 0 : i32
    %c0_i32_1 = arith.constant 0 : i32
    return %arg0, %c0_i32, %c0_i32_0 : i32, i32, i32
  }
  func.func @transform_4(%arg0: i32, %arg1: i32) -> (i32, i32, i32) {
    %c0_i32 = arith.constant 0 : i32
    %c0_i32_0 = arith.constant 0 : i32
    %c0_i32_1 = arith.constant 0 : i32
    return %arg0, %c0_i32, %c0_i32_0 : i32, i32, i32
  }
}

</mosaic_0001>

<bundles_post_ra>
// kernel: tpu_custom_call.1
= control target key start
LH: loop header
LB: loop body
LE: loop exit
PB: predicated region body
PF: predicated region fallthrough
CT: control target
= control target key end

     0   :  { %10 = vsyncpa [#allocation3], 0  ;;  %s403_s0 = inlined_call_operand.hbm [shape: f32[16,128], index: 0, kind: input, shape index: {}]   ;;  %s404_s1 = inlined_call_operand.hbm [shape: f32[16,128], index: 1, kind: input, shape index: {}]   ;;  %s405_s2 = inlined_call_operand.hbm [shape: f32[16,128], index: 2, kind: input, shape index: {}]   ;;  %s406_s3 = inlined_call_operand.hbm [shape: f32[1,1,128], index: 3, kind: output, shape index: {0}]   ;;  %s407_s4 = inlined_call_operand.hbm [shape: f32[1,1,128], index: 4, kind: output, shape index: {1}]  }
   0x1   :  { %11 = vsyncpa [#allocation6], 0 }
   0x2   :  { %12 = vsyncpa [#allocation4], 0 }
   0x3   :  { %13 = vsyncpa [#allocation10], 0  ;;  %s43_s17 = sshll.u32 %s404_s1, 4  ;;  %s355_s18 = smov [#allocation5]   ;;  %s44_s17 = int_to_ptr.hbm [resolvable:$true] %s43_s17 }
   0x4   :  { %s45_s19 = sshll.u32 %s355_s18, 4  ;;  %s24_s22 = sshll.u32 %s403_s0, 4  ;;  %s46_s19 = int_to_ptr.vmem [resolvable:$true] %s45_s19  ;;  %s25_s22 = int_to_ptr.hbm [resolvable:$true] %s24_s22 }
   0x5   :  { %s356_s23 = smov 128   ;;  %s357_s24 = smov 8  }
   0x6   :  { %51 = dma.hbm_to_vmem [thread:$0]  %s44_s17, 256, %s46_s19, [#allocation6], %s356_s23, %s356_s23, %s357_s24  }
   0x7   :  { %s358_s25 = smov [#allocation2]   ;;  %s62_s29 = sshll.u32 %s405_s2, 4  ;;  %s63_s29 = int_to_ptr.hbm [resolvable:$true] %s62_s29 }
   0x8   :  { %s26_s26 = sshll.u32 %s358_s25, 4  ;;  %s359_s1 = smov [#allocation7]   ;;  %s27_s26 = int_to_ptr.vmem [resolvable:$true] %s26_s26 }
   0x9   :  { %32 = dma.hbm_to_vmem [thread:$0]  %s25_s22, 256, %s27_s26, [#allocation3], %s356_s23, %s356_s23, %s357_s24  }
   0xa   :  { %s64_s30 = sshll.u32 %s359_s1, 4  ;;  %s65_s30 = int_to_ptr.vmem [resolvable:$true] %s64_s30 }
   0xb   :  { %70 = dma.hbm_to_vmem [thread:$0]  %s63_s29, 256, %s65_s30, [#allocation6], %s356_s23, %s356_s23, %s357_s24  }
   0xc   :  { %347 = dma.done.wait [#allocation3], 256  }
   0xd   :  { %348 = vsyncadd [#allocation3], 4294967040 }
   0xe   :  { %349 = dma.done.wait [#allocation6], 512  }
   0xf   :  { %350 = vsyncadd [#allocation6], 4294966784  ;;  %v360_v0 = vmov 0.0   ;;  %v101_v1 = vld [vmem:[#allocation2] sm:$0xff]  ;;  %v102_v2 = vld [vmem:[#allocation2 + $0x8] sm:$0xff]  ;;  %s361_s0 = smov [#allocation9]  }
  0x10   :  { %99 = vst [vmem:[#allocation8] sm:$0x1] %v360_v0  ;;  %v103_v3 = vld [vmem:[#allocation5] sm:$0xff]  ;;  %v104_v4 = vld [vmem:[#allocation5 + $0x8] sm:$0xff]  ;;  %v105_v6 = vld [vmem:[#allocation7] sm:$0xff]  ;;  %s195_s2 = sshll.u32 %s361_s0, 4  ;;  %s196_s2 = int_to_ptr.vmem [resolvable:$true] %s195_s2 }
  0x11   :  { %100 = vst [vmem:[#allocation9] sm:$0x1] %v360_v0  ;;  %v115_v5 = vsub.f32 %v101_v1, %v103_v3  ;;  %v116_v7 = vsub.f32 %v102_v2, %v104_v4  ;;  %v106_v8 = vld [vmem:[#allocation7 + $0x8] sm:$0xff]  ;;  %s197_s7 = sshll.u32 %s407_s4, 4  ;;  %s362_s8 = smov [#allocation8]   ;;  %s198_s7 = int_to_ptr.hbm [resolvable:$true] %s197_s7 }
  0x12   :  { %v129_v10 = vadd.f32 %v106_v8, %v105_v6  ;;  %s184_s9 = sshll.u32 %s362_s8, 4  ;;  %s186_s12 = sshll.u32 %s406_s3, 4  ;;  %s185_s9 = int_to_ptr.vmem [resolvable:$true] %s184_s9  ;;  %s187_s12 = int_to_ptr.hbm [resolvable:$true] %s186_s12 }
  0x13   :  { %v117_v9 = vand.u32 2147483647, %v115_v5  ;;  %v118_v11 = vand.u32 2147483647, %v116_v7 }
  0x14   :  { %v130_v12 = vrot.slane %v129_v10, 4 }
  0x15   :  { %v119_v13 = vadd.f32 %v118_v11, %v117_v9 }
  0x16   :  { %v131_v14 = vadd.f32 %v130_v12, %v129_v10 }
  0x17   :  { %v120_v15 = vrot.slane %v119_v13, 4  ;;  %v114_v25 = vld [vmem:[#allocation8] sm:$0x1] }
  0x18   :  { %v132_v16 = vrot.slane %v131_v14, 2  ;;  %v128_v22 = vld [vmem:[#allocation9] sm:$0x1] }
  0x19   :  { %v121_v17 = vadd.f32 %v120_v15, %v119_v13 }
  0x1a   :  { %v133_v18 = vadd.f32 %v132_v16, %v131_v14 }
  0x1b   :  { %v122_v19 = vrot.slane %v121_v17, 2 }
  0x1c   :  { %v134_v20 = vrot.slane %v133_v18, 1 }
  0x1d   :  { %v123_v21 = vadd.f32 %v122_v19, %v121_v17 }
  0x1e   :  { %v135_v23 = vadd.f32 %v134_v20, %v133_v18 }
  0x1f   :  { %v124_v24 = vrot.slane %v123_v21, 1 }
  0x20   :  { %v136_v26 = vadd.f32 %v135_v23, %v128_v22 }
  0x21   :  { %v125_v27 = vadd.f32 %v124_v24, %v123_v21 }
  0x22   :  { %137 = vst [vmem:[#allocation9] sm:$0x1] %v136_v26 }
  0x23   :  { %v126_v28 = vadd.f32 %v125_v27, %v114_v25  ;;  %200 = dma.vmem_to_hbm [thread:$0]  %s196_s2, 16, %s198_s7, [#allocation10]  }
  0x25   :  { %127 = vst [vmem:[#allocation8] sm:$0x1] %v126_v28 }
  0x26   :  { %189 = dma.vmem_to_hbm [thread:$0]  %s185_s9, 16, %s187_s12, [#allocation4]  }
  0x27   :  { %351 = dma.done.wait [#allocation4], 16  }
  0x28   :  { %352 = vsyncadd [#allocation4], 4294967280 }
  0x29   :  { %353 = dma.done.wait [#allocation10], 16  }
  0x2a   :  { %354 = vsyncadd [#allocation10], 4294967280 }
  0x2b   :  { %209 = vsyncpa [#allocation3], 1 }
  0x2c   :  { %210 = vsyncpa [#allocation6], 1 }
  0x2d   :  { %211 = vsyncpa [#allocation4], 1 }
  0x2e   :  { %212 = vsyncpa [#allocation10], 1 }

</bundles_post_ra>
